<compile_context>
chip_gen: v7x
topology: tpu7x:2x2x1
jax: 0.10.0
libtpu: 0.0.40
codegen_flags: <defaults>
</compile_context>

<pallas_src>
import functools

import jax
import jax.numpy as jnp
from jax.experimental import pallas as pl
from jax.experimental.pallas import tpu as pltpu


# ---------------------------------------------------------------------------
# Kernels
# ---------------------------------------------------------------------------

def _bn_stats_kernel(x_ref, sum_ref, sumsq_ref):
    # x_ref: (1, C, Lt) tile.  sum_ref / sumsq_ref: (C, 1) f32 accumulators that
    # stay VMEM-resident across the whole grid (constant output block index).
    @pl.when((pl.program_id(0) == 0) & (pl.program_id(1) == 0))
    def _init():
        sum_ref[...] = jnp.zeros_like(sum_ref)
        sumsq_ref[...] = jnp.zeros_like(sumsq_ref)

    x = x_ref[0].astype(jnp.float32)                      # (C, Lt), per-tile cast
    sum_ref[...] += jnp.sum(x, axis=-1, keepdims=True)
    sumsq_ref[...] += jnp.sum(x * x, axis=-1, keepdims=True)


def _bn_apply_kernel(x_ref, scale_ref, shift_ref, o_ref):
    # x_ref: (1, C, Lt);  scale/shift: (C, 1) f32;  o_ref: (1, C, Lt).
    x = x_ref[0].astype(jnp.float32)                      # (C, Lt)
    o_ref[0] = (x * scale_ref[...] + shift_ref[...]).astype(o_ref.dtype)


# ---------------------------------------------------------------------------
# pallas_call wrappers
# ---------------------------------------------------------------------------

def _choose_l_tile(hw, c, dtype_bytes, target_bytes=2 << 20):
    """Largest lane-dense tile (multiple of 128, divides hw) under ~target_bytes."""
    if hw % 128 != 0:
        return hw  # full-extent block is always legal per BlockSpec rules
    best = 128
    lt = 128
    while lt <= hw:
        if hw % lt == 0 and c * lt * dtype_bytes <= target_bytes:
            best = lt
        lt *= 2
    return best


def _bn_stats(x_flat):
    """x_flat: (N, C, HW) -> per-channel (sum, sumsq), each (C, 1) float32."""
    N, C, HW = x_flat.shape
    lt = _choose_l_tile(HW, C, x_flat.dtype.itemsize)
    grid = (N, HW // lt)
    return pl.pallas_call(
        _bn_stats_kernel,
        out_shape=(
            jax.ShapeDtypeStruct((C, 1), jnp.float32),
            jax.ShapeDtypeStruct((C, 1), jnp.float32),
        ),
        grid_spec=pltpu.PrefetchScalarGridSpec(
            num_scalar_prefetch=0,
            grid=grid,
            in_specs=[pl.BlockSpec((1, C, lt), lambda n, l: (n, 0, l))],
            out_specs=[
                pl.BlockSpec((C, 1), lambda n, l: (0, 0)),
                pl.BlockSpec((C, 1), lambda n, l: (0, 0)),
            ],
        ),
        compiler_params=pltpu.CompilerParams(
            # Both grid axes feed the same resident accumulator -> reduction axes.
            dimension_semantics=("arbitrary", "arbitrary"),
        ),
    )(x_flat)


def _bn_apply(x_flat, scale, shift):
    """x_flat: (N, C, HW); scale/shift: (C, 1) f32 -> y (N, C, HW) in x dtype."""
    N, C, HW = x_flat.shape
    lt = _choose_l_tile(HW, C, x_flat.dtype.itemsize)
    grid = (N, HW // lt)
    return pl.pallas_call(
        _bn_apply_kernel,
        out_shape=jax.ShapeDtypeStruct((N, C, HW), x_flat.dtype),
        grid_spec=pltpu.PrefetchScalarGridSpec(
            num_scalar_prefetch=0,
            grid=grid,
            in_specs=[
                pl.BlockSpec((1, C, lt), lambda n, l: (n, 0, l)),
                pl.BlockSpec((C, 1), lambda n, l: (0, 0)),
                pl.BlockSpec((C, 1), lambda n, l: (0, 0)),
            ],
            out_specs=pl.BlockSpec((1, C, lt), lambda n, l: (n, 0, l)),
        ),
        compiler_params=pltpu.CompilerParams(
            # Independent tiles: let megacore (v7x) shard across both TCs.
            dimension_semantics=("parallel", "parallel"),
        ),
    )(x_flat, scale, shift)


@functools.partial(jax.jit, static_argnames=("eps",))
def switchable_bn2d_forward(x, weight, bias, *, eps=1e-5):
    """Training-mode BatchNorm2d forward on NCHW input (no running-stat update)."""
    N, C, H, W = x.shape
    HW = H * W
    x_flat = x.reshape(N, C, HW)          # free reshape, no transpose

    s, ss = _bn_stats(x_flat)
    count = jnp.float32(N * HW)           # true global element count per channel
    mean = s / count
    var = jnp.maximum(ss / count - mean * mean, 0.0)   # biased variance
    inv_std = jax.lax.rsqrt(var + jnp.float32(eps))
    scale = weight.reshape(C, 1).astype(jnp.float32) * inv_std
    shift = bias.reshape(C, 1).astype(jnp.float32) - mean * scale

    y_flat = _bn_apply(x_flat, scale, shift)
    return y_flat.reshape(N, C, H, W)


# ---------------------------------------------------------------------------
# Module wrapper (mirrors SwitchableBatchNorm2d.forward)
# ---------------------------------------------------------------------------

class SwitchableBatchNorm2dPallas:
    """JAX/Pallas port of SwitchableBatchNorm2d (forward only, training-mode BN)."""

    def __init__(self, num_features_list, wml, key):
        self.num_features_list = list(num_features_list)
        self.num_features = max(num_features_list)
        self.width_mult_list = list(wml)
        self.width_mult = max(wml)
        self.eps = 1e-5
        # One (weight, bias) pair per BatchNorm2d in the ModuleList.
        # Deterministic, non-trivial init (PyTorch default would be ones/zeros).
        self.params = []
        for nf in self.num_features_list:
            key, kw, kb = jax.random.split(key, 3)
            w = 1.0 + 0.1 * jax.random.normal(kw, (nf,), dtype=jnp.float32)
            b = 0.1 * jax.random.normal(kb, (nf,), dtype=jnp.float32)
            self.params.append((w, b))

    def __call__(self, x):
        idx = self.width_mult_list.index(self.width_mult)  # static python index
        weight, bias = self.params[idx]
        assert x.shape[1] == self.num_features_list[idx]
        return switchable_bn2d_forward(x, weight, bias, eps=self.eps)


# ---------------------------------------------------------------------------
# Reference + test
# ---------------------------------------------------------------------------

def _reference_bn(x, weight, bias, eps=1e-5):
    # Pure-JAX training-mode BatchNorm2d reference (NCHW).
    mean = jnp.mean(x, axis=(0, 2, 3), keepdims=True)
    var = jnp.mean((x - mean) ** 2, axis=(0, 2, 3), keepdims=True)
    w = weight.reshape(1, -1, 1, 1)
    b = bias.reshape(1, -1, 1, 1)
    return (x - mean) / jnp.sqrt(var + eps) * w + b


if __name__ == "__main__":
    key = jax.random.PRNGKey(0)
    key, k_in, k_mod = jax.random.split(key, 3)

    # Module config: switchable widths; forward always picks the max width.
    num_features_list = [2, 4]          # max -> 4 channels
    width_mult_list = [0.5, 1.0]        # max -> 1.0 -> idx 1

    N, C, H, W = 2, 4, 16, 16
    x = jax.random.normal(k_in, (N, C, H, W), dtype=jnp.float32)

    module = SwitchableBatchNorm2dPallas(num_features_list, width_mult_list, k_mod)
    y = module(x)
    y = jax.block_until_ready(y)

    # Sanity-check against a pure-JAX reference.
    idx = width_mult_list.index(max(width_mult_list))
    w_ref, b_ref = module.params[idx]
    y_ref = _reference_bn(x, w_ref, b_ref)
    assert y.shape == y_ref.shape
    assert jnp.allclose(y, y_ref, atol=1e-5, rtol=1e-5), "mismatch vs reference"

    print("KERNEL_OK")
</pallas_src>

<mosaic_0001>
module attributes {stable_mosaic.version = 11 : i64} {
  func.func @_bn_stats_kernel(%arg0: i32, %arg1: i32, %arg2: memref<1x4x256xf32, #tpu.memory_space<vmem>>, %arg3: memref<4x1xf32, #tpu.memory_space<vmem>>, %arg4: memref<4x1xf32, #tpu.memory_space<vmem>>) attributes {dimension_semantics = [#tpu.dimension_semantics<arbitrary>, #tpu.dimension_semantics<arbitrary>], iteration_bounds = array<i64: 2, 1>, scalar_prefetch = 0 : i64, scratch_operands = 0 : i64, tpu.core_type = #tpu.core_type<tc>, window_params = [{transform_indices = @transform_0, window_bounds = array<i64: 1, 4, 256>}, {pipeline_mode = #tpu.pipeline_mode<synchronous>, transform_indices = @transform_1, window_bounds = array<i64: 4, 1>}, {pipeline_mode = #tpu.pipeline_mode<synchronous>, transform_indices = @transform_2, window_bounds = array<i64: 4, 1>}]} {
    %c0_i32 = arith.constant 0 : i32
    %0 = arith.cmpi eq, %arg0, %c0_i32 : i32
    %c0_i32_0 = arith.constant 0 : i32
    %1 = arith.cmpi eq, %arg1, %c0_i32_0 : i32
    %2 = arith.andi %0, %1 : i1
    %3 = arith.extui %2 : i1 to i32
    %c0_i32_1 = arith.constant 0 : i32
    %4 = arith.cmpi ne, %3, %c0_i32_1 : i32
    scf.if %4 {
      %cst_13 = arith.constant 0.000000e+00 : f32
      %18 = vector.broadcast %cst_13 : f32 to vector<4x1xf32>
      %c0_14 = arith.constant 0 : index
      %c0_15 = arith.constant 0 : index
      %19 = vector.load %arg3[%c0_14, %c0_15] : memref<4x1xf32, #tpu.memory_space<vmem>>, vector<4x1xf32>
      tpu.vector_store %arg3[%c0_14, %c0_15], %18 {strides = array<i32>} : memref<4x1xf32, #tpu.memory_space<vmem>>, vector<4x1xf32>,
      %cst_16 = arith.constant 0.000000e+00 : f32
      %20 = vector.broadcast %cst_16 : f32 to vector<4x1xf32>
      %c0_17 = arith.constant 0 : index
      %c0_18 = arith.constant 0 : index
      %21 = vector.load %arg4[%c0_17, %c0_18] : memref<4x1xf32, #tpu.memory_space<vmem>>, vector<4x1xf32>
      tpu.vector_store %arg4[%c0_17, %c0_18], %20 {strides = array<i32>} : memref<4x1xf32, #tpu.memory_space<vmem>>, vector<4x1xf32>,
    } else {
    }
    %c0 = arith.constant 0 : index
    %c0_2 = arith.constant 0 : index
    %c0_3 = arith.constant 0 : index
    %5 = vector.load %arg2[%c0, %c0_2, %c0_3] : memref<1x4x256xf32, #tpu.memory_space<vmem>>, vector<1x4x256xf32>
    %6 = vector.shape_cast %5 : vector<1x4x256xf32> to vector<4x256xf32>
    %c0_4 = arith.constant 0 : index
    %c0_5 = arith.constant 0 : index
    %7 = vector.load %arg3[%c0_4, %c0_5] : memref<4x1xf32, #tpu.memory_space<vmem>>, vector<4x1xf32>
    %cst = arith.constant dense<0.000000e+00> : vector<4xf32>
    %8 = vector.multi_reduction <add>, %6, %cst [1] : vector<4x256xf32> to vector<4xf32>
    %9 = vector.shape_cast %8 : vector<4xf32> to vector<4x1xf32>
    %10 = arith.addf %7, %9 : vector<4x1xf32>
    %c0_6 = arith.constant 0 : index
    %c0_7 = arith.constant 0 : index
    %11 = vector.load %arg3[%c0_6, %c0_7] : memref<4x1xf32, #tpu.memory_space<vmem>>, vector<4x1xf32>
    tpu.vector_store %arg3[%c0_6, %c0_7], %10 {strides = array<i32>} : memref<4x1xf32, #tpu.memory_space<vmem>>, vector<4x1xf32>,
    %c0_8 = arith.constant 0 : index
    %c0_9 = arith.constant 0 : index
    %12 = vector.load %arg4[%c0_8, %c0_9] : memref<4x1xf32, #tpu.memory_space<vmem>>, vector<4x1xf32>
    %13 = arith.mulf %6, %6 : vector<4x256xf32>
    %cst_10 = arith.constant dense<0.000000e+00> : vector<4xf32>
    %14 = vector.multi_reduction <add>, %13, %cst_10 [1] : vector<4x256xf32> to vector<4xf32>
    %15 = vector.shape_cast %14 : vector<4xf32> to vector<4x1xf32>
    %16 = arith.addf %12, %15 : vector<4x1xf32>
    %c0_11 = arith.constant 0 : index
    %c0_12 = arith.constant 0 : index
    %17 = vector.load %arg4[%c0_11, %c0_12] : memref<4x1xf32, #tpu.memory_space<vmem>>, vector<4x1xf32>
    tpu.vector_store %arg4[%c0_11, %c0_12], %16 {strides = array<i32>} : memref<4x1xf32, #tpu.memory_space<vmem>>, vector<4x1xf32>,
    return
  }
  func.func @transform_0(%arg0: i32, %arg1: i32) -> (i32, i32, i32) {
    %c0_i32 = arith.constant 0 : i32
    %c0_i32_0 = arith.constant 0 : i32
    return %arg0, %c0_i32, %arg1 : i32, i32, i32
  }
  func.func @transform_1(%arg0: i32, %arg1: i32) -> (i32, i32) {
    %c0_i32 = arith.constant 0 : i32
    %c0_i32_0 = arith.constant 0 : i32
    %c0_i32_1 = arith.constant 0 : i32
    return %c0_i32, %c0_i32_0 : i32, i32
  }
  func.func @transform_2(%arg0: i32, %arg1: i32) -> (i32, i32) {
    %c0_i32 = arith.constant 0 : i32
    %c0_i32_0 = arith.constant 0 : i32
    %c0_i32_1 = arith.constant 0 : i32
    return %c0_i32, %c0_i32_0 : i32, i32
  }
}

module attributes {stable_mosaic.version = 11 : i64} {
  func.func @_bn_apply_kernel(%arg0: i32, %arg1: i32, %arg2: memref<1x4x256xf32, #tpu.memory_space<vmem>>, %arg3: memref<4x1xf32, #tpu.memory_space<vmem>>, %arg4: memref<4x1xf32, #tpu.memory_space<vmem>>, %arg5: memref<1x4x256xf32, #tpu.memory_space<vmem>>) attributes {dimension_semantics = [#tpu.dimension_semantics<parallel>, #tpu.dimension_semantics<parallel>], iteration_bounds = array<i64: 2, 1>, scalar_prefetch = 0 : i64, scratch_operands = 0 : i64, tpu.core_type = #tpu.core_type<tc>, window_params = [{transform_indices = @transform_0, window_bounds = array<i64: 1, 4, 256>}, {pipeline_mode = #tpu.pipeline_mode<synchronous>, transform_indices = @transform_1, window_bounds = array<i64: 4, 1>}, {pipeline_mode = #tpu.pipeline_mode<synchronous>, transform_indices = @transform_2, window_bounds = array<i64: 4, 1>}, {transform_indices = @transform_3, window_bounds = array<i64: 1, 4, 256>}]} {
    %c0 = arith.constant 0 : index
    %c0_0 = arith.constant 0 : index
    %c0_1 = arith.constant 0 : index
    %0 = vector.load %arg2[%c0, %c0_0, %c0_1] : memref<1x4x256xf32, #tpu.memory_space<vmem>>, vector<1x4x256xf32>
    %1 = vector.shape_cast %0 : vector<1x4x256xf32> to vector<4x256xf32>
    %c0_2 = arith.constant 0 : index
    %c0_3 = arith.constant 0 : index
    %2 = vector.load %arg3[%c0_2, %c0_3] : memref<4x1xf32, #tpu.memory_space<vmem>>, vector<4x1xf32>
    %3 = vector.broadcast %2 : vector<4x1xf32> to vector<4x256xf32>
    %4 = arith.mulf %1, %3 : vector<4x256xf32>
    %c0_4 = arith.constant 0 : index
    %c0_5 = arith.constant 0 : index
    %5 = vector.load %arg4[%c0_4, %c0_5] : memref<4x1xf32, #tpu.memory_space<vmem>>, vector<4x1xf32>
    %6 = vector.broadcast %5 : vector<4x1xf32> to vector<4x256xf32>
    %7 = arith.addf %4, %6 : vector<4x256xf32>
    %c0_6 = arith.constant 0 : index
    %c0_7 = arith.constant 0 : index
    %c0_8 = arith.constant 0 : index
    %8 = vector.load %arg5[%c0_6, %c0_7, %c0_8] : memref<1x4x256xf32, #tpu.memory_space<vmem>>, vector<1x4x256xf32>
    %9 = vector.shape_cast %8 : vector<1x4x256xf32> to vector<4x256xf32>
    %10 = vector.shape_cast %7 : vector<4x256xf32> to vector<1x4x256xf32>
    tpu.vector_store %arg5[%c0_6, %c0_7, %c0_8], %10 {strides = array<i32>} : memref<1x4x256xf32, #tpu.memory_space<vmem>>, vector<1x4x256xf32>,
    return
  }
  func.func @transform_0(%arg0: i32, %arg1: i32) -> (i32, i32, i32) {
    %c0_i32 = arith.constant 0 : i32
    %c0_i32_0 = arith.constant 0 : i32
    return %arg0, %c0_i32, %arg1 : i32, i32, i32
  }
  func.func @transform_1(%arg0: i32, %arg1: i32) -> (i32, i32) {
    %c0_i32 = arith.constant 0 : i32
    %c0_i32_0 = arith.constant 0 : i32
    %c0_i32_1 = arith.constant 0 : i32
    return %c0_i32, %c0_i32_0 : i32, i32
  }
  func.func @transform_2(%arg0: i32, %arg1: i32) -> (i32, i32) {
    %c0_i32 = arith.constant 0 : i32
    %c0_i32_0 = arith.constant 0 : i32
    %c0_i32_1 = arith.constant 0 : i32
    return %c0_i32, %c0_i32_0 : i32, i32
  }
  func.func @transform_3(%arg0: i32, %arg1: i32) -> (i32, i32, i32) {
    %c0_i32 = arith.constant 0 : i32
    %c0_i32_0 = arith.constant 0 : i32
    return %arg0, %c0_i32, %arg1 : i32, i32, i32
  }
}

</mosaic_0001>

<bundles_post_ra>
// kernel: switchable_bn2d_forward.3
= control target key start
LH: loop header
LB: loop body
LE: loop exit
PB: predicated region body
PF: predicated region fallthrough
CT: control target
= control target key end

     0   :  { %s413_s12 = smov 0   ;;  %s415_s13 = smov 0   ;;  %s452_s0 = inlined_call_operand.vmem [shape: f32[2,4,256], index: 0, kind: input, shape index: {}]   ;;  %s453_s1 = inlined_call_operand.vmem [shape: f32[4,1], index: 1, kind: input, shape index: {}]   ;;  %s454_s2 = inlined_call_operand.vmem [shape: f32[4,1], index: 2, kind: input, shape index: {}]   ;;  %s455_s3 = inlined_call_operand.vmem [shape: f32[2,4,256], index: 3, kind: output, shape index: {}]  }
   0x1   :  { %s417_s14 = smov 0  }
   0x2 LB: > { %s25_s15 = sadd.s32 1, %s385_s13  ;;  %p331_p0 = scmp.ge.s32.totalorder %s389_s14, 1  ;;  %s389_s14 = sphi %s417_s14, %s13_s14   ;;  %s385_s13 = sphi %s415_s13, %s457_s13   ;;  %s381_s12 = sphi %s413_s12, %s456_s12  }
   0x3   : > { %p27_p1 = scmp.ge.s32.totalorder %s25_s15, 2  ;;  %p158_p2 = scmp.lt.s32.totalorder %s389_s14, 3 }
   0x5   : > { %s459_s15 = smov (%p27_p1, %s25_s15), 0  ;;  %p159_p3 = pnand %p331_p0, %p158_p2 }
   0x6   : > { %v211_v0 = vld [vmem:[%s453_s1] sm:$0xf] (!%p159_p3)  ;;  %v391_v1 = vmov (!%p159_p3), 0   ;;  %p191_p4 = scmp.lt.s32.totalorder (!%p159_p3), %s381_s12, 1  ;;  %v392_v3 = vmov (!%p159_p3), 839922192   ;;  %v219_v5 = vlaneseq (!%p159_p3) }
   0x7   : > { %162 = sbr.rel (%p159_p3) target bundleno = 145 (0x91), region = 32  ;;  %366 = vset.pattern.permute.xlu0 (!%p159_p3), %v391_v1  ;;  %v225_v2 = vld [vmem:[%s454_s2] sm:$0xf] (!%p159_p3)  ;;  %v217_v4 = vunpack.c.l.s4 (!%p159_p3), %v392_v3 }
   0x8   : > { %214 = vperm.xlu0 (!%p159_p3), %366, %v211_v0   ;;  %v220_v7 = vshrl.u32 (!%p159_p3), %v219_v5, 7 }
   0x9   : > { %v218_v6 = vunpack.c.0.s8 (!%p159_p3), %v217_v4 }
   0xb   : > { %v221_v8 = vsub.s32 (!%p159_p3), %v218_v6, %v220_v7 }
   0xc   : > { %228 = vperm.xlu0 (!%p159_p3), %366, %v225_v2  }
   0xe   : > { %s461_s12 = smov (!%p191_p4, %s381_s12), 1 }
   0xf   : > { %s338_s20 = sshll.u32 %s461_s12, 3 }
  0x10   : > { %s198_s23 = scalar_lea.vmem %s452_s0, %s338_s20  ;;  %s208_s26 = scalar_lea.vmem %s455_s3, %s338_s20 }
  0x11   : > { %v210_v11 = vld [vmem:[%s198_s23] sm:$0xff] }
  0x87   : > { %v215_v9 = vpop.permute.xlu0 %214 }
  0x88   : > { %v222_v10 = vrot.slane %v215_v9, %v221_v8 }
  0x8a   : > { %v224_v13 = vmul.f32 %v222_v10, %v210_v11 }
  0x8b   : > { %v229_v12 = vpop.permute.xlu0 %228 }
  0x8c   : > { %v236_v14 = vrot.slane %v229_v12, %v221_v8 }
  0x8e   : > { %v238_v15 = vadd.f32 %v236_v14, %v224_v13 }
  0x90   : > { %239 = vst [vmem:[%s208_s26] sm:$0xff] %v238_v15 }
  0x91 PF: > { %s13_s14 = sadd.s32 1, %s389_s14   ;;  %s456_s12 = smov %s385_s13 }
  0x92   : > { %p10_p5 = scmp.ge.s32.totalorder %s13_s14, 4   ;;  %s457_s13 = smov %s459_s15 }
  0x94   :  { %12 = sbr.rel (!%p10_p5) target bundleno = 2 (0x2), region = 62 }

// kernel: switchable_bn2d_forward.2
= control target key start
LH: loop header
LB: loop body
LE: loop exit
PB: predicated region body
PF: predicated region fallthrough
CT: control target
= control target key end

     0   :  { %s315_s9 = smov 0   ;;  %s317_s10 = smov 0   ;;  %s363_s0 = inlined_call_operand.vmem [shape: f32[2,4,256], index: 0, kind: input, shape index: {}]   ;;  %s364_s1 = inlined_call_operand.vmem [shape: f32[4,1], index: 1, kind: output, shape index: {0}]   ;;  %s365_s2 = inlined_call_operand.vmem [shape: f32[4,1], index: 2, kind: output, shape index: {1}]  }
   0x1   :  { %s319_s11 = smov 0  }
   0x2 LB: > { %s25_s12 = sadd.s32 1, %s293_s10  ;;  %p241_p0 = scmp.ge.s32.totalorder %s297_s11, 1  ;;  %s297_s11 = sphi %s319_s11, %s13_s11   ;;  %s293_s10 = sphi %s317_s10, %s367_s10   ;;  %s289_s9 = sphi %s315_s9, %s366_s9  }
   0x3   : > { %p27_p1 = scmp.ge.s32.totalorder %s25_s12, 2  ;;  %p124_p2 = scmp.lt.s32.totalorder %s297_s11, 3 }
   0x5   : > { %s369_s12 = smov (%p27_p1, %s25_s12), 0  ;;  %p125_p3 = pnand %p241_p0, %p124_p2 }
   0x6   : > { %p146_p4 = scmp.lt.s32.totalorder (!%p125_p3), %s289_s9, 1  ;;  %p155_p5 = scmp.eq.s32.totalorder (!%p125_p3), %s289_s9, 0 }
   0x7   : > { %128 = sbr.rel (%p125_p3) target bundleno = 176 (0xb0), region = 24 }
   0xe   : > { %s371_s9 = smov (!%p146_p4, %s289_s9), 1  ;;  %160 = sbr.rel (!%p155_p5) target bundleno = 21 (0x15), region = 28 }
   0xf   : > { %s247_s13 = sshll.u32 %s371_s9, 3  ;;  %vm161_vm0 = vcmask (%p155_p5), 3072   ;;  %v299_v0 = vmov (%p155_p5), 0.0  }
  0x10   : > { %s153_s16 = scalar_lea.vmem %s363_s0, %s247_s13  ;;  %162 = vst.msk [vmem:[%s364_s1] sm:$0xf] (%p155_p5), %vm161_vm0, %v299_v0  ;;  %163 = vst.msk [vmem:[%s365_s2] sm:$0xf] (%p155_p5), %vm161_vm0, %v299_v0 }
  0x15 PF: > { %v164_v1 = vld [vmem:[%s153_s16] sm:$0xff]  ;;  %vm169_vm1 = vcmask 1043456   ;;  %vm176_vm2 = vcmask 3072  }
  0x16   : > { %v167_v2 = vcombine.high %v164_v1, %v164_v1  ;;  %v170_v3 = vsel %vm169_vm1, %v164_v1, 0.0  ;;  %v179_v4 = vmul.f32 %v164_v1, %v164_v1 }
  0x17   : > { %v165_v11 = vld [vmem:[%s364_s1] sm:$0xf] }
  0x18   : > { %v171_v5 = vsel %vm169_vm1, %v167_v2, 0.0  ;;  %v181_v6 = vcombine.high %v179_v4, %v179_v4  ;;  %v183_v7 = vsel %vm169_vm1, %v179_v4, 0.0  ;;  %v178_v14 = vld [vmem:[%s365_s2] sm:$0xf] }
  0x19   : > { %v172_v8 = vadd.f32 %v171_v5, %v170_v3 }
  0x1a   : > { %v184_v9 = vsel %vm169_vm1, %v181_v6, 0.0 }
  0x1b   : > { %173 = vadd.xlane.f32.xlu0 %v172_v8  ;;  %v185_v10 = vadd.f32 %v184_v9, %v183_v7 }
  0x1f   : > { %186 = vadd.xlane.f32.xlu0 %v185_v10 }
  0xa8   : > { %v174_v12 = vpop.xlane.xlu0 %173 }
  0xa9   : > { %v175_v13 = vadd.f32 %v174_v12, %v165_v11 }
  0xab   : > { %177 = vst.msk [vmem:[%s364_s1] sm:$0xf] %vm176_vm2, %v175_v13 }
  0xac   : > { %v187_v15 = vpop.xlane.xlu0 %186 }
  0xad   : > { %v188_v16 = vadd.f32 %v187_v15, %v178_v14 }
  0xaf   : > { %189 = vst.msk [vmem:[%s365_s2] sm:$0xf] %vm176_vm2, %v188_v16 }
  0xb0 PF: > { %s13_s11 = sadd.s32 1, %s297_s11   ;;  %s366_s9 = smov %s293_s10 }
  0xb1   : > { %p10_p6 = scmp.ge.s32.totalorder %s13_s11, 4   ;;  %s367_s10 = smov %s369_s12 }
  0xb3   :  { %12 = sbr.rel (!%p10_p6) target bundleno = 2 (0x2), region = 62 }

</bundles_post_ra>
